<compile_context>
chip_gen: v5e
topology: v5e:2x2
jax: 0.10.0
libtpu: 0.0.40
codegen_flags: <defaults>
</compile_context>

<pallas_src>
import jax
import jax.numpy as jnp
from jax.experimental import pallas as pl
from jax.experimental.pallas import tpu as pltpu


# ---------------------------------------------------------------------------
# Kernels
# ---------------------------------------------------------------------------

def _resident_kernel(ids_ref, pos_ref, tok_ref, o_ref, gather_ref):
    # ids_ref:    (B, S) int32 in SMEM (scalar prefetch) -- indices only.
    # pos_ref:    (P, D) positional table, fully VMEM-resident (DMA'd once).
    # tok_ref:    (V, D) token table, fully VMEM-resident (DMA'd once).
    # o_ref:      (1, TOK, D) output tile in VMEM.
    # gather_ref: (TOK, D) VMEM scratch for the gathered rows.
    sblk = pl.program_id(0)
    b = pl.program_id(1)
    TOK = o_ref.shape[1]
    V = tok_ref.shape[0]

    base = sblk * TOK
    if TOK % 8 == 0:
        base = pl.multiple_of(base, 8)

    # Row gather via in-VMEM dynamic-slice vector loads: a few cycles per row,
    # no DMA descriptors, no per-row HBM round trips.
    for j in range(TOK):  # TOK is static and capped -> unrolled at trace time
        tid = jnp.clip(ids_ref[b, base + j], 0, V - 1)  # clamp OOB ids
        gather_ref[pl.ds(j, 1), :] = tok_ref[pl.ds(tid, 1), :]

    # Fused positional add: one VPU pass, lane-dense full-tile store.
    o_ref[0] = (gather_ref[...] + pos_ref[pl.ds(base, TOK), :]).astype(o_ref.dtype)


def _hbm_gather_kernel(ids_ref, pos_ref, tok_hbm, o_ref, gather_ref, sem_ref):
    # ids_ref:    (B, S) int32 in SMEM (scalar prefetch).
    # pos_ref:    (P, D) positional table, fully VMEM-resident (DMA'd once).
    # tok_hbm:    (V, D) token table left in HBM (memory_space=pl.ANY).
    # o_ref:      (1, TOK, D) output tile in VMEM.
    # gather_ref: (2, TOK, D) VMEM double buffer for the gathered rows.
    # sem_ref:    (2,) DMA semaphores, one per buffer slot, shared by all TOK
    #             row copies of that slot.
    sblk = pl.program_id(0)
    b = pl.program_id(1)
    n_b = pl.num_programs(1)
    n_steps = pl.num_programs(0) * n_b
    TOK = o_ref.shape[1]
    V = tok_hbm.shape[0]

    step = sblk * n_b + b

    def issue(step_idx, slot):
        # Issue all TOK row DMAs of grid step `step_idx` into buffer `slot`.
        # They all signal sem_ref[slot] and are issued back-to-back so their
        # HBM latencies overlap each other.
        s_i = step_idx // n_b
        b_i = step_idx % n_b
        blk_base = s_i * TOK
        for j in range(TOK):
            tid = jnp.clip(ids_ref[b_i, blk_base + j], 0, V - 1)
            pltpu.make_async_copy(
                tok_hbm.at[pl.ds(tid, 1)],
                gather_ref.at[slot, pl.ds(j, 1)],
                sem_ref.at[slot],
            ).start()

    # Prime the pipeline.  The grid runs with ("arbitrary", "arbitrary")
    # semantics, i.e. strictly sequentially on one TC, so priming on the
    # global first step is safe even on 2-TC (v7x) parts.
    @pl.when(step == 0)
    def _():
        issue(0, 0)

    # Prefetch the NEXT step's rows before waiting on the current slot so the
    # next block's HBM gather latency hides behind this block's wait + add +
    # output writeback (ids for the whole (B, S) array are already in SMEM).
    @pl.when(step + 1 < n_steps)
    def _():
        issue(step + 1, (step + 1) % 2)

    # Retire this slot's TOK row copies: single shared semaphore per slot,
    # tight loop of size-matched waits.
    slot = step % 2
    for j in range(TOK):
        pltpu.make_async_copy(
            tok_hbm.at[pl.ds(0, 1)],
            gather_ref.at[slot, pl.ds(j, 1)],
            sem_ref.at[slot],
        ).wait()

    base = sblk * TOK
    if TOK % 8 == 0:
        base = pl.multiple_of(base, 8)
    o_ref[0] = (gather_ref[slot] + pos_ref[pl.ds(base, TOK), :]).astype(o_ref.dtype)


# ---------------------------------------------------------------------------
# Wrapper
# ---------------------------------------------------------------------------

_SUBLANE_MULT = {1: 32, 2: 16, 4: 8, 8: 8}   # per-dtype sublane packing


def _pick_token_block(seq_len, sublane, cap=256):
    """Largest multiple of `sublane` dividing seq_len, capped at `cap`.

    Falls back to the full sequence length (a block dim equal to the full
    array dim always satisfies Mosaic's tiling rules).
    """
    best = None
    for blk in range(sublane, min(seq_len, cap) + 1, sublane):
        if seq_len % blk == 0:
            best = blk
    return best if best is not None else seq_len


def _vmem_budget_bytes():
    """Per-generation VMEM budget, with headroom for compiler scratch."""
    try:
        cap = pltpu.get_tpu_info().vmem_capacity_bytes
    except Exception:
        cap = 64 << 20   # conservative: v7x has 64 MiB per TensorCore
    return int(cap * 3 // 4)


def embeddings_forward(token_ids, token_table, pos_table, *,
                       tokens_per_block=None, force_hbm_gather=False):
    """token_ids: (B, S) int -> (B, S, D) = token_table[ids] + pos_table[:S]."""
    B, S = token_ids.shape
    V, D = token_table.shape
    P, Dp = pos_table.shape
    assert D == Dp, "embedding dimensions must match"
    assert S <= P, "sequence length exceeds positional block_size"

    token_ids = token_ids.astype(jnp.int32)
    dtype = token_table.dtype
    itemsize = jnp.dtype(dtype).itemsize
    sublane = _SUBLANE_MULT.get(itemsize, 8)

    TOK = (tokens_per_block if tokens_per_block is not None
           else _pick_token_block(S, sublane))
    assert S % TOK == 0, "tokens_per_block must divide sequence length"

    grid = (S // TOK, B)          # sequence blocks outer, batch inner
    budget = _vmem_budget_bytes()

    # VMEM needed by the resident-table fast path.
    resident_need = (
        (V * D + P * D) * itemsize          # resident token + positional tables
        + 2 * TOK * D * itemsize            # double-buffered (1, TOK, D) output
        + TOK * D * itemsize                # gather scratch
        + (2 << 20)                         # headroom
    )
    use_resident = (not force_hbm_gather) and (resident_need <= budget)

    # Positional table: fully resident (constant block index -> DMA'd once).
    pos_spec = pl.BlockSpec((P, D), lambda s, b, ids: (0, 0))
    out_spec = pl.BlockSpec((1, TOK, D), lambda s, b, ids: (b, s, 0))

    if use_resident:
        kernel = _resident_kernel
        # Token table fully resident in VMEM: DMA'd from HBM exactly once.
        tok_spec = pl.BlockSpec((V, D), lambda s, b, ids: (0, 0))
        scratch = [pltpu.VMEM((TOK, D), dtype)]
        # No cross-step state -> both axes may be megacore-parallel (v7x).
        semantics = ("parallel", "parallel")
    else:
        kernel = _hbm_gather_kernel
        # Token table stays in HBM; rows gathered with pipelined manual DMAs.
        tok_spec = pl.BlockSpec(memory_space=pl.ANY)
        scratch = [pltpu.VMEM((2, TOK, D), dtype),     # double-buffered gather
                   pltpu.SemaphoreType.DMA((2,))]      # one shared sem per slot
        # Cross-step prefetch state -> keep the grid strictly sequential so the
        # step==0 priming is valid under v7x megacore sharding as well.
        semantics = ("arbitrary", "arbitrary")

    return pl.pallas_call(
        kernel,
        out_shape=jax.ShapeDtypeStruct((B, S, D), dtype),
        grid_spec=pltpu.PrefetchScalarGridSpec(
            num_scalar_prefetch=1,              # token_ids -> SMEM
            grid=grid,
            in_specs=[pos_spec, tok_spec],
            out_specs=out_spec,
            scratch_shapes=scratch,
        ),
        compiler_params=pltpu.CompilerParams(
            dimension_semantics=semantics,
            vmem_limit_bytes=budget,            # raise v5e's tiny default limit
        ),
    )(token_ids, pos_table, token_table)


if __name__ == "__main__":
    # Small shapes consistent with the module; D chosen lane-dense (128).
    vocabulary_size = 512
    embedding_dimension = 128
    block_size = 16
    batch = 2
    seq = 8

    key = jax.random.PRNGKey(0)
    k_tok, k_pos, k_ids = jax.random.split(key, 3)

    # nn.Embedding default init: N(0, 1).
    token_table = jax.random.normal(
        k_tok, (vocabulary_size, embedding_dimension), dtype=jnp.float32)
    pos_table = jax.random.normal(
        k_pos, (block_size, embedding_dimension), dtype=jnp.float32)
    token_ids = jax.random.randint(
        k_ids, (batch, seq), 0, vocabulary_size, dtype=jnp.int32)

    # Pure-JAX reference (same f32 arithmetic -> tight tolerance).
    ref = token_table[token_ids] + pos_table[:seq][None, :, :]

    # Fast path: token table resident in VMEM (512x128 f32 = 256 KiB).
    out = jax.block_until_ready(
        embeddings_forward(token_ids, token_table, pos_table))
    assert out.shape == (batch, seq, embedding_dimension)
    assert jnp.allclose(out, ref, atol=1e-6, rtol=1e-6), "resident path mismatch"

    # Fallback path: table left in HBM, pipelined double-buffered row gathers.
    out_hbm = jax.block_until_ready(
        embeddings_forward(token_ids, token_table, pos_table,
                           force_hbm_gather=True))
    assert jnp.allclose(out_hbm, ref, atol=1e-6, rtol=1e-6), "HBM path mismatch"

    print("KERNEL_OK")
</pallas_src>

<mosaic_0001>
module attributes {stable_mosaic.version = 11 : i64} {
  func.func @_resident_kernel(%arg0: i32, %arg1: i32, %arg2: memref<2x8xi32, #tpu.memory_space<smem>>, %arg3: memref<16x128xf32, #tpu.memory_space<vmem>>, %arg4: memref<512x128xf32, #tpu.memory_space<vmem>>, %arg5: memref<1x8x128xf32, #tpu.memory_space<vmem>>, %arg6: memref<8x128xf32, #tpu.memory_space<vmem>>) attributes {dimension_semantics = [#tpu.dimension_semantics<parallel>, #tpu.dimension_semantics<parallel>], iteration_bounds = array<i64: 1, 2>, scalar_prefetch = 1 : i64, scratch_operands = 1 : i64, tpu.core_type = #tpu.core_type<tc>, window_params = [{pipeline_mode = #tpu.pipeline_mode<synchronous>, transform_indices = @transform_0, window_bounds = array<i64: 16, 128>}, {pipeline_mode = #tpu.pipeline_mode<synchronous>, transform_indices = @transform_1, window_bounds = array<i64: 512, 128>}, {transform_indices = @transform_2, window_bounds = array<i64: 1, 8, 128>}]} {
    %c8_i32 = arith.constant 8 : i32
    %0 = arith.muli %arg0, %c8_i32 : i32
    %1 = tpu.assume_multiple %0, 8 : i32
    %c0_i32 = arith.constant 0 : i32
    %2 = arith.addi %1, %c0_i32 : i32
    %3 = arith.index_cast %arg1 : i32 to index
    %4 = arith.index_cast %2 : i32 to index
    %5 = memref.load %arg2[%3, %4] : memref<2x8xi32, #tpu.memory_space<smem>>
    %c0_i32_0 = arith.constant 0 : i32
    %c511_i32 = arith.constant 511 : i32
    %6 = arith.maxsi %c0_i32_0, %5 : i32
    %7 = arith.minsi %c511_i32, %6 : i32
    %8 = arith.index_cast %7 : i32 to index
    %c0 = arith.constant 0 : index
    %9 = vector.load %arg4[%8, %c0] : memref<512x128xf32, #tpu.memory_space<vmem>>, vector<1x128xf32>
    %c0_1 = arith.constant 0 : index
    %c0_2 = arith.constant 0 : index
    %10 = vector.load %arg6[%c0_1, %c0_2] : memref<8x128xf32, #tpu.memory_space<vmem>>, vector<1x128xf32>
    tpu.vector_store %arg6[%c0_1, %c0_2], %9 {strides = array<i32>} : memref<8x128xf32, #tpu.memory_space<vmem>>, vector<1x128xf32>,
    %c1_i32 = arith.constant 1 : i32
    %11 = arith.addi %1, %c1_i32 : i32
    %12 = arith.index_cast %arg1 : i32 to index
    %13 = arith.index_cast %11 : i32 to index
    %14 = memref.load %arg2[%12, %13] : memref<2x8xi32, #tpu.memory_space<smem>>
    %c0_i32_3 = arith.constant 0 : i32
    %c511_i32_4 = arith.constant 511 : i32
    %15 = arith.maxsi %c0_i32_3, %14 : i32
    %16 = arith.minsi %c511_i32_4, %15 : i32
    %17 = arith.index_cast %16 : i32 to index
    %c0_5 = arith.constant 0 : index
    %18 = vector.load %arg4[%17, %c0_5] : memref<512x128xf32, #tpu.memory_space<vmem>>, vector<1x128xf32>
    %c1 = arith.constant 1 : index
    %c0_6 = arith.constant 0 : index
    %19 = vector.load %arg6[%c1, %c0_6] : memref<8x128xf32, #tpu.memory_space<vmem>>, vector<1x128xf32>
    tpu.vector_store %arg6[%c1, %c0_6], %18 {strides = array<i32>} : memref<8x128xf32, #tpu.memory_space<vmem>>, vector<1x128xf32>,
    %c2_i32 = arith.constant 2 : i32
    %20 = arith.addi %1, %c2_i32 : i32
    %21 = arith.index_cast %arg1 : i32 to index
    %22 = arith.index_cast %20 : i32 to index
    %23 = memref.load %arg2[%21, %22] : memref<2x8xi32, #tpu.memory_space<smem>>
    %c0_i32_7 = arith.constant 0 : i32
    %c511_i32_8 = arith.constant 511 : i32
    %24 = arith.maxsi %c0_i32_7, %23 : i32
    %25 = arith.minsi %c511_i32_8, %24 : i32
    %26 = arith.index_cast %25 : i32 to index
    %c0_9 = arith.constant 0 : index
    %27 = vector.load %arg4[%26, %c0_9] : memref<512x128xf32, #tpu.memory_space<vmem>>, vector<1x128xf32>
    %c2 = arith.constant 2 : index
    %c0_10 = arith.constant 0 : index
    %28 = vector.load %arg6[%c2, %c0_10] : memref<8x128xf32, #tpu.memory_space<vmem>>, vector<1x128xf32>
    tpu.vector_store %arg6[%c2, %c0_10], %27 {strides = array<i32>} : memref<8x128xf32, #tpu.memory_space<vmem>>, vector<1x128xf32>,
    %c3_i32 = arith.constant 3 : i32
    %29 = arith.addi %1, %c3_i32 : i32
    %30 = arith.index_cast %arg1 : i32 to index
    %31 = arith.index_cast %29 : i32 to index
    %32 = memref.load %arg2[%30, %31] : memref<2x8xi32, #tpu.memory_space<smem>>
    %c0_i32_11 = arith.constant 0 : i32
    %c511_i32_12 = arith.constant 511 : i32
    %33 = arith.maxsi %c0_i32_11, %32 : i32
    %34 = arith.minsi %c511_i32_12, %33 : i32
    %35 = arith.index_cast %34 : i32 to index
    %c0_13 = arith.constant 0 : index
    %36 = vector.load %arg4[%35, %c0_13] : memref<512x128xf32, #tpu.memory_space<vmem>>, vector<1x128xf32>
    %c3 = arith.constant 3 : index
    %c0_14 = arith.constant 0 : index
    %37 = vector.load %arg6[%c3, %c0_14] : memref<8x128xf32, #tpu.memory_space<vmem>>, vector<1x128xf32>
    tpu.vector_store %arg6[%c3, %c0_14], %36 {strides = array<i32>} : memref<8x128xf32, #tpu.memory_space<vmem>>, vector<1x128xf32>,
    %c4_i32 = arith.constant 4 : i32
    %38 = arith.addi %1, %c4_i32 : i32
    %39 = arith.index_cast %arg1 : i32 to index
    %40 = arith.index_cast %38 : i32 to index
    %41 = memref.load %arg2[%39, %40] : memref<2x8xi32, #tpu.memory_space<smem>>
    %c0_i32_15 = arith.constant 0 : i32
    %c511_i32_16 = arith.constant 511 : i32
    %42 = arith.maxsi %c0_i32_15, %41 : i32
    %43 = arith.minsi %c511_i32_16, %42 : i32
    %44 = arith.index_cast %43 : i32 to index
    %c0_17 = arith.constant 0 : index
    %45 = vector.load %arg4[%44, %c0_17] : memref<512x128xf32, #tpu.memory_space<vmem>>, vector<1x128xf32>
    %c4 = arith.constant 4 : index
    %c0_18 = arith.constant 0 : index
    %46 = vector.load %arg6[%c4, %c0_18] : memref<8x128xf32, #tpu.memory_space<vmem>>, vector<1x128xf32>
    tpu.vector_store %arg6[%c4, %c0_18], %45 {strides = array<i32>} : memref<8x128xf32, #tpu.memory_space<vmem>>, vector<1x128xf32>,
    %c5_i32 = arith.constant 5 : i32
    %47 = arith.addi %1, %c5_i32 : i32
    %48 = arith.index_cast %arg1 : i32 to index
    %49 = arith.index_cast %47 : i32 to index
    %50 = memref.load %arg2[%48, %49] : memref<2x8xi32, #tpu.memory_space<smem>>
    %c0_i32_19 = arith.constant 0 : i32
    %c511_i32_20 = arith.constant 511 : i32
    %51 = arith.maxsi %c0_i32_19, %50 : i32
    %52 = arith.minsi %c511_i32_20, %51 : i32
    %53 = arith.index_cast %52 : i32 to index
    %c0_21 = arith.constant 0 : index
    %54 = vector.load %arg4[%53, %c0_21] : memref<512x128xf32, #tpu.memory_space<vmem>>, vector<1x128xf32>
    %c5 = arith.constant 5 : index
    %c0_22 = arith.constant 0 : index
    %55 = vector.load %arg6[%c5, %c0_22] : memref<8x128xf32, #tpu.memory_space<vmem>>, vector<1x128xf32>
    tpu.vector_store %arg6[%c5, %c0_22], %54 {strides = array<i32>} : memref<8x128xf32, #tpu.memory_space<vmem>>, vector<1x128xf32>,
    %c6_i32 = arith.constant 6 : i32
    %56 = arith.addi %1, %c6_i32 : i32
    %57 = arith.index_cast %arg1 : i32 to index
    %58 = arith.index_cast %56 : i32 to index
    %59 = memref.load %arg2[%57, %58] : memref<2x8xi32, #tpu.memory_space<smem>>
    %c0_i32_23 = arith.constant 0 : i32
    %c511_i32_24 = arith.constant 511 : i32
    %60 = arith.maxsi %c0_i32_23, %59 : i32
    %61 = arith.minsi %c511_i32_24, %60 : i32
    %62 = arith.index_cast %61 : i32 to index
    %c0_25 = arith.constant 0 : index
    %63 = vector.load %arg4[%62, %c0_25] : memref<512x128xf32, #tpu.memory_space<vmem>>, vector<1x128xf32>
    %c6 = arith.constant 6 : index
    %c0_26 = arith.constant 0 : index
    %64 = vector.load %arg6[%c6, %c0_26] : memref<8x128xf32, #tpu.memory_space<vmem>>, vector<1x128xf32>
    tpu.vector_store %arg6[%c6, %c0_26], %63 {strides = array<i32>} : memref<8x128xf32, #tpu.memory_space<vmem>>, vector<1x128xf32>,
    %c7_i32 = arith.constant 7 : i32
    %65 = arith.addi %1, %c7_i32 : i32
    %66 = arith.index_cast %arg1 : i32 to index
    %67 = arith.index_cast %65 : i32 to index
    %68 = memref.load %arg2[%66, %67] : memref<2x8xi32, #tpu.memory_space<smem>>
    %c0_i32_27 = arith.constant 0 : i32
    %c511_i32_28 = arith.constant 511 : i32
    %69 = arith.maxsi %c0_i32_27, %68 : i32
    %70 = arith.minsi %c511_i32_28, %69 : i32
    %71 = arith.index_cast %70 : i32 to index
    %c0_29 = arith.constant 0 : index
    %72 = vector.load %arg4[%71, %c0_29] : memref<512x128xf32, #tpu.memory_space<vmem>>, vector<1x128xf32>
    %c7 = arith.constant 7 : index
    %c0_30 = arith.constant 0 : index
    %73 = vector.load %arg6[%c7, %c0_30] : memref<8x128xf32, #tpu.memory_space<vmem>>, vector<1x128xf32>
    tpu.vector_store %arg6[%c7, %c0_30], %72 {strides = array<i32>} : memref<8x128xf32, #tpu.memory_space<vmem>>, vector<1x128xf32>,
    %c0_31 = arith.constant 0 : index
    %c0_32 = arith.constant 0 : index
    %74 = vector.load %arg6[%c0_31, %c0_32] : memref<8x128xf32, #tpu.memory_space<vmem>>, vector<8x128xf32>
    %75 = arith.index_cast %1 : i32 to index
    %c0_33 = arith.constant 0 : index
    %76 = vector.load %arg3[%75, %c0_33] : memref<16x128xf32, #tpu.memory_space<vmem>>, vector<8x128xf32>
    %77 = arith.addf %74, %76 : vector<8x128xf32>
    %c0_34 = arith.constant 0 : index
    %c0_35 = arith.constant 0 : index
    %c0_36 = arith.constant 0 : index
    %78 = vector.load %arg5[%c0_34, %c0_35, %c0_36] : memref<1x8x128xf32, #tpu.memory_space<vmem>>, vector<1x8x128xf32>
    %79 = vector.shape_cast %78 : vector<1x8x128xf32> to vector<8x128xf32>
    %80 = vector.shape_cast %77 : vector<8x128xf32> to vector<1x8x128xf32>
    tpu.vector_store %arg5[%c0_34, %c0_35, %c0_36], %80 {strides = array<i32>} : memref<1x8x128xf32, #tpu.memory_space<vmem>>, vector<1x8x128xf32>,
    return
  }
  func.func @transform_0(%arg0: i32, %arg1: i32, %arg2: memref<2x8xi32, #tpu.memory_space<smem>>) -> (i32, i32) {
    %c0_i32 = arith.constant 0 : i32
    %c0_i32_0 = arith.constant 0 : i32
    %c0_i32_1 = arith.constant 0 : i32
    return %c0_i32, %c0_i32_0 : i32, i32
  }
  func.func @transform_1(%arg0: i32, %arg1: i32, %arg2: memref<2x8xi32, #tpu.memory_space<smem>>) -> (i32, i32) {
    %c0_i32 = arith.constant 0 : i32
    %c0_i32_0 = arith.constant 0 : i32
    %c0_i32_1 = arith.constant 0 : i32
    return %c0_i32, %c0_i32_0 : i32, i32
  }
  func.func @transform_2(%arg0: i32, %arg1: i32, %arg2: memref<2x8xi32, #tpu.memory_space<smem>>) -> (i32, i32, i32) {
    %c0_i32 = arith.constant 0 : i32
    %c0_i32_0 = arith.constant 0 : i32
    return %arg1, %arg0, %c0_i32 : i32, i32, i32
  }
}

</mosaic_0001>

<bundles_post_ra>
// kernel: tpu_custom_call.1
= control target key start
LH: loop header
LB: loop body
LE: loop exit
PB: predicated region body
PF: predicated region fallthrough
CT: control target
= control target key end

     0   :  { %s735_s15 = smov [#allocation4]   ;;  %s911_s0 = inlined_call_operand.hbm [shape: s32[2,8], index: 0, kind: input, shape index: {}]   ;;  %s912_s1 = inlined_call_operand.hbm [shape: f32[16,128], index: 1, kind: input, shape index: {}]   ;;  %s913_s2 = inlined_call_operand.hbm [shape: f32[512,128], index: 2, kind: input, shape index: {}]   ;;  %s914_s3 = inlined_call_operand.hbm [shape: f32[2,8,128], index: 3, kind: output, shape index: {}]  }
   0x1   :  { %s9_s14 = sshll.u32 %s911_s0, 4  ;;  %s10_s14 = int_to_ptr.hbm [resolvable:$true] %s9_s14 }
   0x2   :  { %12 = dma.hbm_to_smem %s10_s14, 32, %s735_s15, [#allocation3] }
   0x3   :  { %697 = dma.done.wait [#allocation3], 32 }
   0x4   :  { %698 = vsyncadd [#allocation3], 4294967264 }
   0x5   :  { %15 = sfence }
   0x6   :  { %16 = vsyncpa [#allocation6], 0 }
   0x7   :  { %17 = vsyncpa [#allocation9], 0 }
   0x8   :  { %18 = vsyncpa [#allocation7], 0 }
   0x9   :  { %20 = vsyncpa [#allocation7 + $0x1], 0  ;;  %s763_s16 = smov 0   ;;  %s765_s17 = smov 0  }
   0xa   :  { %s767_s18 = smov 0   ;;  %s769_s19 = smov 0  }
   0xb   :  { %s771_s20 = smov 0   ;;  %s773_s0 = smov 0  }
   0xc LB: > { %s417_s21 = sadd.s32 4294967295, %s733_s0   ;;  %s418_s22 = sadd.s32 4294967294, %s733_s0   ;;  %s733_s0 = sphi %s773_s0, %s26_s0   ;;  %s729_s20 = sphi %s771_s20, %s923_s20   ;;  %s725_s19 = sphi %s769_s19, %s922_s19   ;;  %s721_s18 = sphi %s767_s18, %s921_s18   ;;  %s717_s17 = sphi %s765_s17, %s920_s17   ;;  %s713_s16 = sphi %s763_s16, %s919_s16  }
   0xd   : > { %s35_s23 = sadd.s32 1, %s729_s20  ;;  %s89_s24 = sadd.s32 1, %s721_s18 }
   0xe   : > { %p36_p0 = scmp.ge.s32.totalorder %s35_s23, 2  ;;  %p99_p1 = scmp.ne.s32.totalorder %s721_s18, %s717_s17 }
   0xf   : > { %p100_p2 = scmp.eq.s32.totalorder %s417_s21, 1  ;;  %p105_p3 = scmp.ne.s32.totalorder %s717_s17, %s713_s16 }
  0x10   : > { %s925_s23 = smov (%p36_p0, %s35_s23), 0  ;;  %p106_p5 = scmp.eq.s32.totalorder %s418_s22, 1 }
  0x11   : > { %p803_p4 = por %p100_p2, %p99_p1  ;;  %s84_s26 = ssub.s32 %s729_s20, %s925_s23 }
  0x12   : > { %p419_p6 = scmp.ge.s32.totalorder %s733_s0, 1  ;;  %p87_p7 = scmp.eq.s32.totalorder %s84_s26, 0 }
  0x13   : > { %p810_p8 = por %p106_p5, %p105_p3  ;;  %p113_p9 = scmp.lt.s32.totalorder %s733_s0, 3 }
  0x14   : > { %s816_s28 = scalar_select %p87_p7, %s721_s18, %s89_s24  }
  0x15   : > { %p818_p10 = pnand %p419_p6, %p113_p9  ;;  %p822_p11 = scmp.eq.s32.totalorder %s417_s21, 0 }
  0x16   : > { %s124_s6 = sshll.u32 %s912_s1, 4  ;;  %s736_s7 = smov [#allocation5]   ;;  %s125_s6 = int_to_ptr.hbm [resolvable:$true] %s124_s6 }
  0x17   : > { %p504_p12 = pneg %p818_p10  ;;  %s126_s8 = sshll.u32 %s736_s7, 4  ;;  %s127_s8 = int_to_ptr.vmem [resolvable:$true] %s126_s8 }
  0x18   : > { %s138_s11 = sshll.u32 %s913_s2, 4  ;;  %s737_s12 = smov 128   ;;  %s139_s11 = int_to_ptr.hbm [resolvable:$true] %s138_s11 }
  0x19   : > { %p505_p13 = pnand %p822_p11, %p504_p12  ;;  %s738_s13 = smov 8  }
  0x1a   : > { %s739_s14 = smov [#allocation8]   ;;  %156 = sbr.rel (%p818_p10) target bundleno = 82 (0x52), region = 28 }
  0x1b   : > { %507 = dma.hbm_to_vmem [thread:$0]  (!%p505_p13), %s125_s6, 256, %s127_s8, [#allocation6], %s737_s12, %s737_s12, %s738_s13  }
  0x1c   : > { %s140_s15 = sshll.u32 %s739_s14, 4  ;;  %s141_s15 = int_to_ptr.vmem [resolvable:$true] %s140_s15 }
  0x1d   : > { %510 = dma.hbm_to_vmem [thread:$0]  (!%p505_p13), %s139_s11, 8192, %s141_s15, [#allocation9], %s737_s12, %s737_s12, %s738_s13  }
  0x1f   : > { %700 = dma.done.wait (%p822_p11), [#allocation6], 256  }
  0x20   : > { %702 = vsyncadd (%p822_p11), [#allocation6], 4294967040 }
  0x21   : > { %704 = dma.done.wait (%p822_p11), [#allocation9], 8192  }
  0x22   : > { %706 = vsyncadd (%p822_p11), [#allocation9], 4294959104  ;;  %s847_s21 = sshll.u32 %s725_s19, 7  ;;  %v309_v8 = vld [vmem:[#allocation5] sm:$0xff] }
  0x23   : > { %s187_s22 = sld [smem:[#allocation4 + %s847_s21]]  ;;  %s202_s24 = sadd.s32 1, %s847_s21 }
  0x24   : > { %s203_s26 = sld [smem:[#allocation4 + %s202_s24]]  ;;  %s218_s29 = sadd.s32 2, %s847_s21 }
  0x25   : > { %s219_s4 = sld [smem:[#allocation4 + %s218_s29]]  ;;  %s234_s5 = sadd.s32 3, %s847_s21 }
  0x26   : > { %s853_s6 = sld [smem:[#allocation4 + %s234_s5]]  ;;  %s250_s30 = sadd.s32 4, %s847_s21 }
  0x27   : > { %s856_s7 = sld [smem:[#allocation4 + %s250_s30]]  ;;  %s266_s8 = sadd.s32 5, %s847_s21 }
  0x28   : > { %s859_s9 = sld [smem:[#allocation4 + %s266_s8]]  ;;  %s282_s10 = sadd.s32 6, %s847_s21 }
  0x29   : > { %p188_p0 = scmp.gt.s32.totalorder %s187_s22, 0  ;;  %p427_p1 = scmp.lt.s32.totalorder %s187_s22, 511 }
  0x2a   : > { %p204_p2 = scmp.gt.s32.totalorder %s203_s26, 0  ;;  %p433_p3 = scmp.lt.s32.totalorder %s203_s26, 511 }
  0x2b   : > { %s927_s22 = smov (!%p188_p0, %s187_s22), 0  ;;  %p220_p5 = scmp.gt.s32.totalorder %s219_s4, 0 }
  0x2c   : > { %s929_s26 = smov (!%p204_p2, %s203_s26), 0  ;;  %s931_s22 = smov (!%p427_p1, %s927_s22), 511 }
  0x2d   : > { %s933_s26 = smov (!%p433_p3, %s929_s26), 511  ;;  %s192_s11 = scalar_lea.vmem [#allocation8], %s931_s22 }
  0x2e   : > { %v193_v0 = vld [vmem:[%s192_s11] sm:$0x1]  ;;  %p439_p6 = scmp.lt.s32.totalorder %s219_s4, 511  ;;  %s208_s12 = scalar_lea.vmem [#allocation8], %s933_s26 }
  0x2f   : > { %194 = vst [vmem:[#allocation2] sm:$0x1] %v193_v0  ;;  %v209_v1 = vld [vmem:[%s208_s12] sm:$0x1]  ;;  %s935_s4 = smov (!%p220_p5, %s219_s4), 0  ;;  %p236_p7 = scmp.gt.s32.totalorder %s853_s6, 0 }
  0x30   : > { %210 = vst [vmem:[#allocation2 + $0x1] sm:$0x1] %v209_v1  ;;  %p445_p9 = scmp.lt.s32.totalorder %s853_s6, 511  ;;  %s937_s4 = smov (!%p439_p6, %s935_s4), 511 }
  0x31   : > { %s939_s6 = smov (!%p236_p7, %s853_s6), 0  ;;  %p252_p10 = scmp.gt.s32.totalorder %s856_s7, 0 }
  0x32   : > { %s224_s13 = scalar_lea.vmem [#allocation8], %s937_s4  ;;  %s941_s6 = smov (!%p445_p9, %s939_s6), 511 }
  0x33   : > { %v225_v2 = vld [vmem:[%s224_s13] sm:$0x1]  ;;  %s253_s14 = scalar_select %p252_p10, %s856_s7, 0 }
  0x34   : > { %226 = vst [vmem:[#allocation2 + $0x2] sm:$0x1] %v225_v2  ;;  %p451_p11 = scmp.lt.s32.totalorder %s856_s7, 511  ;;  %s240_s15 = scalar_lea.vmem [#allocation8], %s941_s6 }
  0x35   : > { %v241_v3 = vld [vmem:[%s240_s15] sm:$0x1]  ;;  %p268_p12 = scmp.gt.s32.totalorder %s859_s9, 0  ;;  %p457_p13 = scmp.lt.s32.totalorder %s859_s9, 511 }
  0x36   : > { %242 = vst [vmem:[#allocation2 + $0x3] sm:$0x1] %v241_v3  ;;  %s943_s14 = smov (!%p451_p11, %s253_s14), 511  ;;  %s283_s22 = sld [smem:[#allocation4 + %s282_s10]] }
  0x37   : > { %s945_s9 = smov (!%p268_p12, %s859_s9), 0  ;;  %s256_s24 = scalar_lea.vmem [#allocation8], %s943_s14 }
  0x38   : > { %v257_v4 = vld [vmem:[%s256_s24] sm:$0x1]  ;;  %s947_s9 = smov (!%p457_p13, %s945_s9), 511  ;;  %s298_s26 = sadd.s32 7, %s847_s21 }
  0x39   : > { %258 = vst [vmem:[#allocation2 + $0x4] sm:$0x1] %v257_v4  ;;  %s299_s29 = sld [smem:[#allocation4 + %s298_s26]]  ;;  %s272_s4 = scalar_lea.vmem [#allocation8], %s947_s9 }
  0x3a   : > { %v273_v5 = vld [vmem:[%s272_s4] sm:$0x1]  ;;  %s176_s5 = sand.u32 1, %s717_s17   ;;  %s475_s7 = sshll.u32 %s725_s19, 3 }
  0x3b   : > { %274 = vst [vmem:[#allocation2 + $0x5] sm:$0x1] %v273_v5  ;;  %s425_s21 = sshll.u32 %s176_s5, 3  ;;  %s324_s10 = scalar_lea.hbm %s914_s3, %s475_s7 }
  0x3c   : > { %p284_p0 = scmp.gt.s32.totalorder %s283_s22, 0  ;;  %p463_p1 = scmp.lt.s32.totalorder %s283_s22, 511 }
  0x3d   : > { %s178_s11 = scalar_lea.vmem [#allocation10], %s425_s21  ;;  %s328_s13 = sshll.u32 %s324_s10, 4  ;;  %s329_s13 = int_to_ptr.hbm [resolvable:$true] %s328_s13 }
  0x3e   : > { %s949_s22 = smov (!%p284_p0, %s283_s22), 0  ;;  %s326_s12 = sshll.u32 %s178_s11, 4  ;;  %s327_s12 = int_to_ptr.vmem [resolvable:$true] %s326_s12 }
  0x3f   : > { %p300_p2 = scmp.gt.s32.totalorder %s299_s29, 0  ;;  %p469_p3 = scmp.lt.s32.totalorder %s299_s29, 511 }
  0x40   : > { %s951_s22 = smov (!%p463_p1, %s949_s22), 511  ;;  %s313_s14 = scalar_lea.sflag [#allocation7], %s176_s5 }
  0x41   : > { %s953_s29 = smov (!%p300_p2, %s299_s29), 0  ;;  %s288_s6 = scalar_lea.vmem [#allocation8], %s951_s22 }
  0x42   : > { %v289_v6 = vld [vmem:[%s288_s6] sm:$0x1]  ;;  %s955_s29 = smov (!%p469_p3, %s953_s29), 511  ;;  %s659_s15 = sshra.s32 %s329_s13, 4  ;;  %s660_s15 = int_to_ptr.hbm [resolvable:$true] %s659_s15 }
  0x43   : > { %290 = vst [vmem:[#allocation2 + $0x6] sm:$0x1] %v289_v6  ;;  %s304_s30 = scalar_lea.vmem [#allocation8], %s955_s29  ;;  %s661_s22 = scalar_lea.hbm %s660_s15, 8 }
  0x44   : > { %v305_v7 = vld [vmem:[%s304_s30] sm:$0x1]  ;;  %p662_p5 = scmp.ne.s32.totalorder %s660_s15, %s661_s22  ;;  %s665_s26 = scalar_lea.hbm %s914_s3, 16 }
  0x45   : > { %306 = vst [vmem:[#allocation2 + $0x7] sm:$0x1] %v305_v7  ;;  %p666_p9 = scmp.lt.s32.totalorder %s660_s15, %s914_s3  ;;  %p667_p10 = scmp.lt.s32.totalorder %s665_s26, %s661_s22 }
  0x46   : > { %p663_p6 = pnand %p662_p5, %p803_p4 }
  0x47   : > { %p668_p11 = por %p667_p10, %p666_p9 }
  0x48   : > { %p664_p7 = pneg %p663_p6 }
  0x4a   : > { %p669_p12 = pnand %p668_p11, %p664_p7 }
  0x4c   : > { %v307_v9 = vld [vmem:[#allocation2] sm:$0xff] }
  0x4d   : > { %v310_v10 = vadd.f32 %v309_v8, %v307_v9 }
  0x4f   : > { %311 = vst [vmem:[%s178_s11] sm:$0xff] %v310_v10 }
  0x50   : > { %672 = shalt.err (!%p669_p12)
}
  0x51   : > { %502 = dma.vmem_to_hbm [thread:$0]  (%p803_p4), %s327_s12, 128, %s329_s13, %s313_s14  }
  0x52 PF: > { %p519_p13 = scmp.ge.s32.totalorder %s733_s0, 2  ;;  %s340_s5 = sand.u32 1, %s713_s16  }
  0x53   : > { %s341_s6 = scalar_lea.sflag [#allocation7], %s340_s5 }
  0x54   : > { %p512_p0 = pnand %p519_p13, %p810_p8 }
  0x56   : > { %p513_p1 = pneg %p512_p0 }
  0x58   : > { %708 = dma.done.wait (%p513_p1), %s341_s6, 128  }
  0x59   : > { %710 = vsyncadd (%p513_p1), %s341_s6, 4294967168  ;;  %s26_s0 = sadd.s32 1, %s733_s0   ;;  %s919_s16 = smov %s717_s17 }
  0x5a   : > { %p23_p2 = scmp.ge.s32.totalorder %s26_s0, 4   ;;  %s920_s17 = smov %s721_s18 }
  0x5b   : > { %s921_s18 = smov %s816_s28  ;;  %s922_s19 = smov %s729_s20 }
  0x5c   : > { %s923_s20 = smov %s925_s23  ;;  %25 = sbr.rel (!%p23_p2) target bundleno = 12 (0xc), region = 78 }
  0x61   :  { %347 = vsyncpa [#allocation6], 1 }
  0x62   :  { %349 = vsyncpa [#allocation6 + $0x1], 1 }
  0x63   :  { %350 = vsyncpa [#allocation9], 1 }
  0x64   :  { %351 = vsyncpa [#allocation7], 1 }
  0x65   :  { %353 = vsyncpa [#allocation7 + $0x1], 1 }

</bundles_post_ra>
